<compile_context>
chip_gen: v5e
topology: v5e:2x2
jax: 0.10.0
libtpu: 0.0.40
codegen_flags: <defaults>
</compile_context>

<pallas_src>
import functools

import jax
import jax.numpy as jnp
from jax import lax
from jax.experimental import pallas as pl
from jax.experimental.pallas import tpu as pltpu


def _bloc_unet_kernel(x_ref, w1_ref, g1_ref, be1_ref,
                      w2_ref, g2_ref, be2_ref, o_ref, *, H, W, Cout):
    eps = 1e-5
    NH = x_ref.shape[0]                      # N * H rows in the lane-dense view
    inv_n = 1.0 / (NH * W)                   # 1 / (N*H*W) elements per channel

    # Row-validity multipliers for the vertical taps (oy = -1 / +1), hoisted:
    # the horizontal shifts and the W-boundary mask live in the packed weights.
    h_idx = lax.broadcasted_iota(jnp.int32, (NH, 1), 0) % H
    up_mul = (h_idx >= 1).astype(jnp.float32)        # row above exists
    dn_mul = (h_idx < (H - 1)).astype(jnp.float32)   # row below exists

    def conv3x3(a, w_ref):
        # a: (NH, W*cin) lane-dense f32 activations.
        # w_ref: (3*W*cin, W*Cout) bf16 per-oy block-tridiagonal weights
        #        stacked along K (ox shifts + W-boundary folded in).
        a_up = pltpu.roll(a, shift=1, axis=0) * up_mul        # oy = -1
        a_dn = pltpu.roll(a, shift=NH - 1, axis=0) * dn_mul   # oy = +1
        stacked = jnp.concatenate([a_up, a, a_dn], axis=1).astype(jnp.bfloat16)
        # Single K = 3*W*cin matmul per conv (bf16 in, f32 accumulate).
        return jnp.dot(stacked, w_ref[...], preferred_element_type=jnp.float32)

    def channel_total(v):
        # v: (1, W*Cout) lane vector.  XLU roll-add tree over the W positions
        # of each channel; afterwards every lane holds its channel's total.
        if (W & (W - 1)) == 0:               # power-of-two W: log2(W) rounds
            k = 1
            while k < W:
                v = v + pltpu.roll(v, shift=k * Cout, axis=1)
                k *= 2
            return v
        tot = v                              # general W fallback: W-1 rolls
        for k in range(1, W):
            tot = tot + pltpu.roll(v, shift=k * Cout, axis=1)
        return tot

    def bn_relu(y, gamma_lane, beta_lane):
        # Training-mode BatchNorm2d (biased batch variance, eps=1e-5) folded
        # into one lane-dense scale/shift FMA, then ReLU.  y is f32 (NH, W*Cout).
        ch_sum = channel_total(jnp.sum(y, axis=0, keepdims=True))       # (1, W*Cout)
        ch_ssq = channel_total(jnp.sum(y * y, axis=0, keepdims=True))   # (1, W*Cout)
        mu = ch_sum * inv_n
        var = ch_ssq * inv_n - mu * mu                                  # biased var
        scale = gamma_lane * lax.rsqrt(var + eps)                       # EUP rsqrt
        shift = beta_lane - mu * scale
        return jnp.maximum(y * scale + shift, 0.0)

    x = x_ref[...]
    y1 = bn_relu(conv3x3(x, w1_ref), g1_ref[...], be1_ref[...])
    y2 = bn_relu(conv3x3(y1, w2_ref), g2_ref[...], be2_ref[...])
    o_ref[...] = y2                          # lane-dense (NH, W*Cout) unmasked store


def _pack_conv_weights(w_oihw, W, cin_pad):
    """Torch conv weight (Cout, Cin, 3, 3) -> (3*W*cin_pad, W*Cout) bf16.

    For each vertical tap dy, the three horizontal taps are pre-summed into one
    block-tridiagonal (W*cin_pad, W*Cout) matrix (horizontal lane shift and the
    W-boundary zero padding folded into the weights); the three dy blocks are
    stacked along K so each conv is a single matmul.
    NOTE: weight bytes / FLOPs scale as O(W^2*Cin*Cout); for large W or C,
    tile the lane dim into 128-wide K blocks instead of growing these krons.
    """
    Cout, Cin = w_oihw.shape[0], w_oihw.shape[1]
    blocks = []
    for dy in range(3):
        m = jnp.zeros((W * cin_pad, W * Cout), jnp.float32)
        for dx in range(3):
            ox = dx - 1
            wt = jnp.zeros((cin_pad, Cout), jnp.float32)
            wt = wt.at[:Cin, :].set(w_oihw[:, :, dy, dx].astype(jnp.float32).T)
            # eye(W, k=-ox)[w_in, w_out] == 1  iff  w_in == w_out + ox  (boundary built in)
            m = m + jnp.kron(jnp.eye(W, k=-ox, dtype=jnp.float32), wt)
        blocks.append(m)
    return jnp.concatenate(blocks, axis=0).astype(jnp.bfloat16)


@jax.jit
def bloc_unet(x_nchw, w1, b1, g1, be1, w2, b2, g2, be2):
    # Conv biases are accepted for API parity but unused: a per-channel
    # constant is exactly cancelled by the train-mode BN mean subtraction.
    del b1, b2
    N, Cin, H, W = x_nchw.shape
    Cout = w1.shape[0]
    # Pad input channels so the input lane dim W*Cp is a multiple of 128
    # (lane-dense view => unmasked vector loads/stores).
    Cp = Cin
    while (W * Cp) % 128 != 0:
        Cp += 1

    # ---- layout plumbing (wrapper-side XLA, not the hot path) -------------
    x_nhwc = jnp.transpose(x_nchw, (0, 2, 3, 1)).astype(jnp.float32)
    x_nhwc = jnp.pad(x_nhwc, ((0, 0), (0, 0), (0, 0), (0, Cp - Cin)))
    x_dense = x_nhwc.reshape(N * H, W * Cp)

    w1_pack = _pack_conv_weights(w1, W, Cp)      # (3*W*Cp,   W*Cout) bf16
    w2_pack = _pack_conv_weights(w2, W, Cout)    # (3*W*Cout, W*Cout) bf16
    g1_lane = jnp.tile(g1.astype(jnp.float32)[None, :], (1, W))     # (1, W*Cout)
    be1_lane = jnp.tile(be1.astype(jnp.float32)[None, :], (1, W))
    g2_lane = jnp.tile(g2.astype(jnp.float32)[None, :], (1, W))
    be2_lane = jnp.tile(be2.astype(jnp.float32)[None, :], (1, W))

    kernel = functools.partial(_bloc_unet_kernel, H=H, W=W, Cout=Cout)
    out_dense = pl.pallas_call(
        kernel,
        out_shape=jax.ShapeDtypeStruct((N * H, W * Cout), jnp.float32),
        in_specs=[pl.BlockSpec(memory_space=pltpu.MemorySpace.VMEM)] * 7,
        out_specs=pl.BlockSpec(memory_space=pltpu.MemorySpace.VMEM),
        compiler_params=pltpu.CompilerParams(
            vmem_limit_bytes=32 * 1024 * 1024),   # safe on v7x's 64 MiB VMEM too
    )(x_dense, w1_pack, g1_lane, be1_lane, w2_pack, g2_lane, be2_lane)

    # back to the PyTorch NCHW layout
    return jnp.transpose(out_dense.reshape(N, H, W, Cout), (0, 3, 1, 2))


def _reference(x, w1, b1, g1, be1, w2, b2, g2, be2):
    """Pure-JAX NCHW reference mirroring the PyTorch forward (with conv bias)."""
    def block(a, w, b, gamma, beta):
        y = lax.conv_general_dilated(
            a, w, window_strides=(1, 1), padding=((1, 1), (1, 1)),
            dimension_numbers=("NCHW", "OIHW", "NCHW"),
            precision=lax.Precision.HIGHEST)
        y = y + b[None, :, None, None]
        mu = jnp.mean(y, axis=(0, 2, 3), keepdims=True)
        var = jnp.mean((y - mu) ** 2, axis=(0, 2, 3), keepdims=True)
        y = (y - mu) / jnp.sqrt(var + 1e-5)
        y = y * gamma[None, :, None, None] + beta[None, :, None, None]
        return jnp.maximum(y, 0.0)
    return block(block(x, w1, b1, g1, be1), w2, b2, g2, be2)


if __name__ == "__main__":
    N, Cin, Cout, H, W = 2, 4, 8, 16, 16

    key = jax.random.PRNGKey(0)
    k_x, k_w1, k_b1, k_w2, k_b2 = jax.random.split(key, 5)

    # PyTorch-convention inputs / parameters.
    x = jax.random.normal(k_x, (N, Cin, H, W), jnp.float32)
    w1 = 0.30 * jax.random.normal(k_w1, (Cout, Cin, 3, 3), jnp.float32)
    b1 = 0.10 * jax.random.normal(k_b1, (Cout,), jnp.float32)
    w2 = 0.15 * jax.random.normal(k_w2, (Cout, Cout, 3, 3), jnp.float32)
    b2 = 0.10 * jax.random.normal(k_b2, (Cout,), jnp.float32)
    # BatchNorm2d default init: weight=1, bias=0
    g1 = jnp.ones((Cout,), jnp.float32)
    be1 = jnp.zeros((Cout,), jnp.float32)
    g2 = jnp.ones((Cout,), jnp.float32)
    be2 = jnp.zeros((Cout,), jnp.float32)

    out = jax.block_until_ready(bloc_unet(x, w1, b1, g1, be1, w2, b2, g2, be2))
    ref = _reference(x, w1, b1, g1, be1, w2, b2, g2, be2)

    assert out.shape == (N, Cout, H, W)
    max_diff = float(jnp.max(jnp.abs(out - ref)))
    assert bool(jnp.allclose(out, ref, rtol=2e-2, atol=2e-2)), (
        "max abs diff %e" % max_diff)

    print("KERNEL_OK")
</pallas_src>

<mosaic_0001>
module attributes {stable_mosaic.version = 11 : i64} {
  func.func @_bloc_unet_kernel(%arg0: memref<32x128xf32, #tpu.memory_space<vmem>>, %arg1: memref<384x128xbf16, #tpu.memory_space<vmem>>, %arg2: memref<1x128xf32, #tpu.memory_space<vmem>>, %arg3: memref<1x128xf32, #tpu.memory_space<vmem>>, %arg4: memref<384x128xbf16, #tpu.memory_space<vmem>>, %arg5: memref<1x128xf32, #tpu.memory_space<vmem>>, %arg6: memref<1x128xf32, #tpu.memory_space<vmem>>, %arg7: memref<32x128xf32, #tpu.memory_space<vmem>>) attributes {dimension_semantics = [], scalar_prefetch = 0 : i64, scratch_operands = 0 : i64, tpu.core_type = #tpu.core_type<tc>} {
    %0 = tpu.iota {dimensions = array<i32: 0>} : vector<32x1xi32>
    %c16_i32 = arith.constant 16 : i32
    %c0_i32 = arith.constant 0 : i32
    %1 = arith.cmpi eq, %c16_i32, %c0_i32 : i32
    %c1_i32 = arith.constant 1 : i32
    %2 = arith.select %1, %c1_i32, %c16_i32 : i32
    %3 = vector.broadcast %2 : i32 to vector<32x1xi32>
    %4 = arith.remsi %0, %3 : vector<32x1xi32>
    %c0_i32_0 = arith.constant 0 : i32
    %5 = vector.broadcast %c0_i32_0 : i32 to vector<32x1xi32>
    %6 = arith.cmpi ne, %4, %5 : vector<32x1xi32>
    %c0_i32_1 = arith.constant 0 : i32
    %7 = vector.broadcast %c0_i32_1 : i32 to vector<32x1xi32>
    %8 = arith.cmpi slt, %4, %7 : vector<32x1xi32>
    %c0_i32_2 = arith.constant 0 : i32
    %9 = arith.cmpi slt, %2, %c0_i32_2 : i32
    %10 = vector.broadcast %9 : i1 to vector<32x1xi1>
    %11 = vector.broadcast %10 : vector<32x1xi1> to vector<32x1xi1>
    %12 = arith.xori %8, %11 : vector<32x1xi1>
    %13 = arith.andi %12, %6 : vector<32x1xi1>
    %14 = vector.broadcast %2 : i32 to vector<32x1xi32>
    %15 = arith.addi %4, %14 : vector<32x1xi32>
    %16 = arith.select %13, %15, %4 : vector<32x1xi1>, vector<32x1xi32>
    %c1_i32_3 = arith.constant 1 : i32
    %17 = vector.broadcast %c1_i32_3 : i32 to vector<32x1xi32>
    %18 = arith.cmpi sge, %16, %17 : vector<32x1xi32>
    %19 = arith.extui %18 : vector<32x1xi1> to vector<32x1xi32>
    %20 = arith.sitofp %19 : vector<32x1xi32> to vector<32x1xf32>
    %c15_i32 = arith.constant 15 : i32
    %21 = vector.broadcast %c15_i32 : i32 to vector<32x1xi32>
    %22 = arith.cmpi slt, %16, %21 : vector<32x1xi32>
    %23 = arith.extui %22 : vector<32x1xi1> to vector<32x1xi32>
    %24 = arith.sitofp %23 : vector<32x1xi32> to vector<32x1xf32>
    %c0 = arith.constant 0 : index
    %c0_4 = arith.constant 0 : index
    %25 = vector.load %arg0[%c0, %c0_4] : memref<32x128xf32, #tpu.memory_space<vmem>>, vector<32x128xf32>
    %c1_i32_5 = arith.constant 1 : i32
    %26 = tpu.dynamic_rotate %25 by %c1_i32_5 dim 0 : vector<32x128xf32>, i32 -> vector<32x128xf32>
    %27 = vector.broadcast %20 : vector<32x1xf32> to vector<32x128xf32>
    %28 = arith.mulf %26, %27 : vector<32x128xf32>
    %c31_i32 = arith.constant 31 : i32
    %29 = tpu.dynamic_rotate %25 by %c31_i32 dim 0 : vector<32x128xf32>, i32 -> vector<32x128xf32>
    %30 = vector.broadcast %24 : vector<32x1xf32> to vector<32x128xf32>
    %31 = arith.mulf %29, %30 : vector<32x128xf32>
    %32 = tpu.concatenate %28, %25, %31 in 1 : vector<32x128xf32>, vector<32x128xf32>, vector<32x128xf32> -> vector<32x384xf32>
    %33 = arith.truncf %32 : vector<32x384xf32> to vector<32x384xbf16>
    %c0_6 = arith.constant 0 : index
    %c0_7 = arith.constant 0 : index
    %34 = vector.load %arg1[%c0_6, %c0_7] : memref<384x128xbf16, #tpu.memory_space<vmem>>, vector<384x128xbf16>
    %cst = arith.constant dense<0.000000e+00> : vector<32x128xf32>
    %35 = tpu.matmul %33, %34, %cst {dimension_numbers = #tpu.dot_dimension_numbers<[1], [0], [0], [1], [0, 0, 1, 1], [], []>} : vector<32x384xbf16>, vector<384x128xbf16>, vector<32x128xf32> -> vector<32x128xf32>
    %c0_8 = arith.constant 0 : index
    %c0_9 = arith.constant 0 : index
    %36 = vector.load %arg2[%c0_8, %c0_9] : memref<1x128xf32, #tpu.memory_space<vmem>>, vector<1x128xf32>
    %c0_10 = arith.constant 0 : index
    %c0_11 = arith.constant 0 : index
    %37 = vector.load %arg3[%c0_10, %c0_11] : memref<1x128xf32, #tpu.memory_space<vmem>>, vector<1x128xf32>
    %cst_12 = arith.constant dense<0.000000e+00> : vector<128xf32>
    %38 = vector.multi_reduction <add>, %35, %cst_12 [0] : vector<32x128xf32> to vector<128xf32>
    %39 = vector.shape_cast %38 : vector<128xf32> to vector<1x128xf32>
    %c8_i32 = arith.constant 8 : i32
    %40 = tpu.dynamic_rotate %39 by %c8_i32 dim 1 : vector<1x128xf32>, i32 -> vector<1x128xf32>
    %41 = arith.addf %39, %40 : vector<1x128xf32>
    %c16_i32_13 = arith.constant 16 : i32
    %42 = tpu.dynamic_rotate %41 by %c16_i32_13 dim 1 : vector<1x128xf32>, i32 -> vector<1x128xf32>
    %43 = arith.addf %41, %42 : vector<1x128xf32>
    %c32_i32 = arith.constant 32 : i32
    %44 = tpu.dynamic_rotate %43 by %c32_i32 dim 1 : vector<1x128xf32>, i32 -> vector<1x128xf32>
    %45 = arith.addf %43, %44 : vector<1x128xf32>
    %c64_i32 = arith.constant 64 : i32
    %46 = tpu.dynamic_rotate %45 by %c64_i32 dim 1 : vector<1x128xf32>, i32 -> vector<1x128xf32>
    %47 = arith.addf %45, %46 : vector<1x128xf32>
    %48 = arith.mulf %35, %35 : vector<32x128xf32>
    %cst_14 = arith.constant dense<0.000000e+00> : vector<128xf32>
    %49 = vector.multi_reduction <add>, %48, %cst_14 [0] : vector<32x128xf32> to vector<128xf32>
    %50 = vector.shape_cast %49 : vector<128xf32> to vector<1x128xf32>
    %c8_i32_15 = arith.constant 8 : i32
    %51 = tpu.dynamic_rotate %50 by %c8_i32_15 dim 1 : vector<1x128xf32>, i32 -> vector<1x128xf32>
    %52 = arith.addf %50, %51 : vector<1x128xf32>
    %c16_i32_16 = arith.constant 16 : i32
    %53 = tpu.dynamic_rotate %52 by %c16_i32_16 dim 1 : vector<1x128xf32>, i32 -> vector<1x128xf32>
    %54 = arith.addf %52, %53 : vector<1x128xf32>
    %c32_i32_17 = arith.constant 32 : i32
    %55 = tpu.dynamic_rotate %54 by %c32_i32_17 dim 1 : vector<1x128xf32>, i32 -> vector<1x128xf32>
    %56 = arith.addf %54, %55 : vector<1x128xf32>
    %c64_i32_18 = arith.constant 64 : i32
    %57 = tpu.dynamic_rotate %56 by %c64_i32_18 dim 1 : vector<1x128xf32>, i32 -> vector<1x128xf32>
    %58 = arith.addf %56, %57 : vector<1x128xf32>
    %cst_19 = arith.constant 0.001953125 : f32
    %59 = vector.broadcast %cst_19 : f32 to vector<1x128xf32>
    %60 = arith.mulf %47, %59 : vector<1x128xf32>
    %cst_20 = arith.constant 0.001953125 : f32
    %61 = vector.broadcast %cst_20 : f32 to vector<1x128xf32>
    %62 = arith.mulf %58, %61 : vector<1x128xf32>
    %63 = arith.mulf %60, %60 : vector<1x128xf32>
    %64 = arith.subf %62, %63 : vector<1x128xf32>
    %cst_21 = arith.constant 9.99999974E-6 : f32
    %65 = vector.broadcast %cst_21 : f32 to vector<1x128xf32>
    %66 = arith.addf %64, %65 : vector<1x128xf32>
    %67 = math.rsqrt %66 : vector<1x128xf32>
    %68 = arith.mulf %36, %67 : vector<1x128xf32>
    %69 = arith.mulf %60, %68 : vector<1x128xf32>
    %70 = arith.subf %37, %69 : vector<1x128xf32>
    %71 = vector.broadcast %68 : vector<1x128xf32> to vector<32x128xf32>
    %72 = arith.mulf %35, %71 : vector<32x128xf32>
    %73 = vector.broadcast %70 : vector<1x128xf32> to vector<32x128xf32>
    %74 = arith.addf %72, %73 : vector<32x128xf32>
    %cst_22 = arith.constant 0.000000e+00 : f32
    %75 = vector.broadcast %cst_22 : f32 to vector<32x128xf32>
    %76 = arith.maximumf %74, %75 : vector<32x128xf32>
    %c1_i32_23 = arith.constant 1 : i32
    %77 = tpu.dynamic_rotate %76 by %c1_i32_23 dim 0 : vector<32x128xf32>, i32 -> vector<32x128xf32>
    %78 = vector.broadcast %20 : vector<32x1xf32> to vector<32x128xf32>
    %79 = arith.mulf %77, %78 : vector<32x128xf32>
    %c31_i32_24 = arith.constant 31 : i32
    %80 = tpu.dynamic_rotate %76 by %c31_i32_24 dim 0 : vector<32x128xf32>, i32 -> vector<32x128xf32>
    %81 = vector.broadcast %24 : vector<32x1xf32> to vector<32x128xf32>
    %82 = arith.mulf %80, %81 : vector<32x128xf32>
    %83 = tpu.concatenate %79, %76, %82 in 1 : vector<32x128xf32>, vector<32x128xf32>, vector<32x128xf32> -> vector<32x384xf32>
    %84 = arith.truncf %83 : vector<32x384xf32> to vector<32x384xbf16>
    %c0_25 = arith.constant 0 : index
    %c0_26 = arith.constant 0 : index
    %85 = vector.load %arg4[%c0_25, %c0_26] : memref<384x128xbf16, #tpu.memory_space<vmem>>, vector<384x128xbf16>
    %cst_27 = arith.constant dense<0.000000e+00> : vector<32x128xf32>
    %86 = tpu.matmul %84, %85, %cst_27 {dimension_numbers = #tpu.dot_dimension_numbers<[1], [0], [0], [1], [0, 0, 1, 1], [], []>} : vector<32x384xbf16>, vector<384x128xbf16>, vector<32x128xf32> -> vector<32x128xf32>
    %c0_28 = arith.constant 0 : index
    %c0_29 = arith.constant 0 : index
    %87 = vector.load %arg5[%c0_28, %c0_29] : memref<1x128xf32, #tpu.memory_space<vmem>>, vector<1x128xf32>
    %c0_30 = arith.constant 0 : index
    %c0_31 = arith.constant 0 : index
    %88 = vector.load %arg6[%c0_30, %c0_31] : memref<1x128xf32, #tpu.memory_space<vmem>>, vector<1x128xf32>
    %cst_32 = arith.constant dense<0.000000e+00> : vector<128xf32>
    %89 = vector.multi_reduction <add>, %86, %cst_32 [0] : vector<32x128xf32> to vector<128xf32>
    %90 = vector.shape_cast %89 : vector<128xf32> to vector<1x128xf32>
    %c8_i32_33 = arith.constant 8 : i32
    %91 = tpu.dynamic_rotate %90 by %c8_i32_33 dim 1 : vector<1x128xf32>, i32 -> vector<1x128xf32>
    %92 = arith.addf %90, %91 : vector<1x128xf32>
    %c16_i32_34 = arith.constant 16 : i32
    %93 = tpu.dynamic_rotate %92 by %c16_i32_34 dim 1 : vector<1x128xf32>, i32 -> vector<1x128xf32>
    %94 = arith.addf %92, %93 : vector<1x128xf32>
    %c32_i32_35 = arith.constant 32 : i32
    %95 = tpu.dynamic_rotate %94 by %c32_i32_35 dim 1 : vector<1x128xf32>, i32 -> vector<1x128xf32>
    %96 = arith.addf %94, %95 : vector<1x128xf32>
    %c64_i32_36 = arith.constant 64 : i32
    %97 = tpu.dynamic_rotate %96 by %c64_i32_36 dim 1 : vector<1x128xf32>, i32 -> vector<1x128xf32>
    %98 = arith.addf %96, %97 : vector<1x128xf32>
    %99 = arith.mulf %86, %86 : vector<32x128xf32>
    %cst_37 = arith.constant dense<0.000000e+00> : vector<128xf32>
    %100 = vector.multi_reduction <add>, %99, %cst_37 [0] : vector<32x128xf32> to vector<128xf32>
    %101 = vector.shape_cast %100 : vector<128xf32> to vector<1x128xf32>
    %c8_i32_38 = arith.constant 8 : i32
    %102 = tpu.dynamic_rotate %101 by %c8_i32_38 dim 1 : vector<1x128xf32>, i32 -> vector<1x128xf32>
    %103 = arith.addf %101, %102 : vector<1x128xf32>
    %c16_i32_39 = arith.constant 16 : i32
    %104 = tpu.dynamic_rotate %103 by %c16_i32_39 dim 1 : vector<1x128xf32>, i32 -> vector<1x128xf32>
    %105 = arith.addf %103, %104 : vector<1x128xf32>
    %c32_i32_40 = arith.constant 32 : i32
    %106 = tpu.dynamic_rotate %105 by %c32_i32_40 dim 1 : vector<1x128xf32>, i32 -> vector<1x128xf32>
    %107 = arith.addf %105, %106 : vector<1x128xf32>
    %c64_i32_41 = arith.constant 64 : i32
    %108 = tpu.dynamic_rotate %107 by %c64_i32_41 dim 1 : vector<1x128xf32>, i32 -> vector<1x128xf32>
    %109 = arith.addf %107, %108 : vector<1x128xf32>
    %cst_42 = arith.constant 0.001953125 : f32
    %110 = vector.broadcast %cst_42 : f32 to vector<1x128xf32>
    %111 = arith.mulf %98, %110 : vector<1x128xf32>
    %cst_43 = arith.constant 0.001953125 : f32
    %112 = vector.broadcast %cst_43 : f32 to vector<1x128xf32>
    %113 = arith.mulf %109, %112 : vector<1x128xf32>
    %114 = arith.mulf %111, %111 : vector<1x128xf32>
    %115 = arith.subf %113, %114 : vector<1x128xf32>
    %cst_44 = arith.constant 9.99999974E-6 : f32
    %116 = vector.broadcast %cst_44 : f32 to vector<1x128xf32>
    %117 = arith.addf %115, %116 : vector<1x128xf32>
    %118 = math.rsqrt %117 : vector<1x128xf32>
    %119 = arith.mulf %87, %118 : vector<1x128xf32>
    %120 = arith.mulf %111, %119 : vector<1x128xf32>
    %121 = arith.subf %88, %120 : vector<1x128xf32>
    %122 = vector.broadcast %119 : vector<1x128xf32> to vector<32x128xf32>
    %123 = arith.mulf %86, %122 : vector<32x128xf32>
    %124 = vector.broadcast %121 : vector<1x128xf32> to vector<32x128xf32>
    %125 = arith.addf %123, %124 : vector<32x128xf32>
    %cst_45 = arith.constant 0.000000e+00 : f32
    %126 = vector.broadcast %cst_45 : f32 to vector<32x128xf32>
    %127 = arith.maximumf %125, %126 : vector<32x128xf32>
    %c0_46 = arith.constant 0 : index
    %c0_47 = arith.constant 0 : index
    %128 = vector.load %arg7[%c0_46, %c0_47] : memref<32x128xf32, #tpu.memory_space<vmem>>, vector<32x128xf32>
    tpu.vector_store %arg7[%c0_46, %c0_47], %127 {strides = array<i32>} : memref<32x128xf32, #tpu.memory_space<vmem>>, vector<32x128xf32>,
    return
  }
}

</mosaic_0001>

<bundles_post_ra>
// kernel: bloc_unet.1
= control target key start
LH: loop header
LB: loop body
LE: loop exit
PB: predicated region body
PF: predicated region fallthrough
CT: control target
= control target key end

     0   :  { %v26_v6 = vlaneseq  ;;  %v1112_v33 = vmov 0.0   ;;  %s1114_s10 = smov 16   ;;  %s1115_s11 = smov 32   ;;  %s1472_s1 = inlined_call_operand.vmem [shape: bf16[384,128], index: 1, kind: input, shape index: {}]   ;;  %s1473_s0 = inlined_call_operand.vmem [shape: f32[32,128], index: 0, kind: input, shape index: {}]   ;;  %s1474_s4 = inlined_call_operand.vmem [shape: bf16[384,128], index: 4, kind: input, shape index: {}]   ;;  %s1475_s2 = inlined_call_operand.vmem [shape: f32[1,128], index: 2, kind: input, shape index: {}]   ;;  %s1476_s3 = inlined_call_operand.vmem [shape: f32[1,128], index: 3, kind: input, shape index: {}]   ;;  %s1477_s5 = inlined_call_operand.vmem [shape: f32[1,128], index: 5, kind: input, shape index: {}]   ;;  %s1478_s6 = inlined_call_operand.vmem [shape: f32[1,128], index: 6, kind: input, shape index: {}]   ;;  %s1479_s7 = inlined_call_operand.vmem [shape: f32[32,128], index: 7, kind: output, shape index: {}]  }
   0x1   :  { %v1046_v0 = vld [vmem:[%s1472_s1 + $0x38] sm:$0xff]  ;;  %v1045_v3 = vld [vmem:[%s1472_s1 + $0x30] sm:$0xff]  ;;  %v1044_v7 = vld [vmem:[%s1472_s1 + $0x28] sm:$0xff]  ;;  %s1116_s12 = smov 64  }
   0x2   :  { %v1054_v1 = vld [vmem:[%s1472_s1 + $0x78] sm:$0xff]  ;;  %331 = vmatpush.bf16.msra.mxu0 %v1046_v0  ;;  %v1053_v4 = vld [vmem:[%s1472_s1 + $0x70] sm:$0xff]  ;;  %v1052_v8 = vld [vmem:[%s1472_s1 + $0x68] sm:$0xff]  ;;  %v1184_v10 = vshrl.u32 %v26_v6, 7 }
   0x3   :  { %v1062_v2 = vld [vmem:[%s1472_s1 + $0xb8] sm:$0xff]  ;;  %350 = vmatpush.bf16.msra.mxu1 %v1054_v1  ;;  %v1061_v5 = vld [vmem:[%s1472_s1 + $0xb0] sm:$0xff]  ;;  %v1060_v9 = vld [vmem:[%s1472_s1 + $0xa8] sm:$0xff] }
   0x4   :  { %369 = vmatpush.bf16.msra.mxu2 %v1062_v2  ;;  %v1043_v11 = vld [vmem:[%s1472_s1 + $0x20] sm:$0xff]  ;;  %v28_v14 = vadd.s32 8, %v1184_v10  ;;  %v1042_v15 = vld [vmem:[%s1472_s1 + $0x18] sm:$0xff]  ;;  %v35_v18 = vand.u32 15, %v1184_v10  ;;  %v104_v21 = vld [vmem:[%s1473_s0 + $0x8] sm:$0xff]  ;;  %vm111_vm1 = vcmp.lt.s32.totalorder %v1184_v10, 1 }
   0x5   :  { %v1051_v12 = vld [vmem:[%s1472_s1 + $0x60] sm:$0xff]  ;;  %v1050_v16 = vld [vmem:[%s1472_s1 + $0x58] sm:$0xff]  ;;  %v1222_v23 = vld [vmem:[%s1473_s0 + $0x10] sm:$0xff]  ;;  %v121_v29 = vrot.slane %v104_v21, 1  ;;  %vm124_vm3 = vcmp.lt.s32.totalorder %v1184_v10, 7  ;;  %v108_v35 = vrot.slane %v104_v21, 7 }
   0x6   :  { %332 = vmatpush.bf16.msra.mxu0 %v1045_v3  ;;  %v1059_v13 = vld [vmem:[%s1472_s1 + $0xa0] sm:$0xff]  ;;  %v1058_v17 = vld [vmem:[%s1472_s1 + $0x98] sm:$0xff]  ;;  %v42_v22 = vand.u32 15, %v28_v14  ;;  %v1041_v24 = vld [vmem:[%s1472_s1 + $0x10] sm:$0xff]  ;;  %vm79_vm0 = vcmp.ge.s32.totalorder %v35_v18, 1  ;;  %v122_v30 = vrot.slane %v1222_v23, 1 }
   0x7   :  { %351 = vmatpush.bf16.msra.mxu1 %v1053_v4  ;;  %v1209_v19 = vld [vmem:[%s1473_s0] sm:$0xff]  ;;  %v1214_v20 = vld [vmem:[%s1473_s0 + $0x18] sm:$0xff]  ;;  %v1049_v25 = vld [vmem:[%s1472_s1 + $0x50] sm:$0xff]  ;;  %v1244_v34 = vsel %vm79_vm0, 1.0, %v1112_v33  ;;  %v29_v48 = vadd.s32 16, %v1184_v10  ;;  %v30_v49 = vadd.s32 24, %v1184_v10 }
   0x8   :  { %370 = vmatpush.bf16.msra.mxu2 %v1061_v5  ;;  %v107_v26 = vrot.slane %v1209_v19, 7  ;;  %v110_v27 = vrot.slane %v1214_v20, 7  ;;  %v1057_v28 = vld [vmem:[%s1472_s1 + $0x90] sm:$0xff]  ;;  %vm92_vm2 = vcmp.lt.s32.totalorder %v42_v22, 15  ;;  %v1040_v31 = vld [vmem:[%s1472_s1 + $0x8] sm:$0xff]  ;;  %v120_v39 = vrot.slane %v1209_v19, 1 }
   0x9   :  { %v1048_v32 = vld [vmem:[%s1472_s1 + $0x48] sm:$0xff]  ;;  %v1251_v38 = vsel %vm92_vm2, 1.0, %v1112_v33  ;;  %v126_v40 = vsel %vm124_vm3, %v121_v29, %v122_v30  ;;  %v1039_v42 = vld [vmem:[%s1472_s1] sm:$0xff]  ;;  %v134_v51 = vpack.c.bf16 %v104_v21, %v1209_v19  ;;  %v49_v53 = vand.u32 15, %v29_v48 }
   0xa   :  { %333 = vmatpush.bf16.msra.mxu0 %v1044_v7  ;;  %v115_v36 = vsel %vm111_vm1, %v110_v27, %v107_v26  ;;  %v1056_v37 = vld [vmem:[%s1472_s1 + $0x88] sm:$0xff]  ;;  %v1047_v43 = vld [vmem:[%s1472_s1 + $0x40] sm:$0xff]  ;;  %v114_v44 = vsel %vm111_vm1, %v107_v26, %v108_v35  ;;  %v130_v45 = vmul.f32 %v1251_v38, %v126_v40  ;;  %v127_v47 = vsel %vm124_vm3, %v120_v39, %v121_v29 }
   0xb   :  { %352 = vmatpush.bf16.msra.mxu1 %v1052_v8  ;;  %v116_v41 = vmul.f32 %v1244_v34, %v115_v36  ;;  %v1055_v46 = vld [vmem:[%s1472_s1 + $0x80] sm:$0xff]  ;;  %v56_v54 = vand.u32 15, %v30_v49  ;;  %v109_v55 = vrot.slane %v1222_v23, 7  ;;  %vm81_vm4 = vcmp.ge.s32.totalorder %v49_v53, 1  ;;  %s1113_s1 = smov 8  }
   0xc   :  { %371 = vmatpush.bf16.msra.mxu2 %v1060_v9  ;;  %v135_v52 = vpack.c.bf16 %v130_v45, %v127_v47  ;;  %v123_v56 = vrot.slane %v1214_v20, 1  ;;  %v1276_v57 = vsel %vm81_vm4, 1.0, %v1112_v33  ;;  %v137_v2 = vpack.c.bf16 %v1214_v20, %v1222_v23 }
   0xd   :  { %v133_v50 = vpack.c.bf16 %v114_v44, %v116_v41  ;;  %vm94_vm5 = vcmp.lt.s32.totalorder %v56_v54, 15  ;;  %v113_v58 = vsel %vm111_vm1, %v108_v35, %v109_v55  ;;  %v112_v62 = vsel %vm111_vm1, %v109_v55, %v110_v27 }
   0xe   :  { %334 = vmatpush.bf16.msra.mxu0 %v1043_v11  ;;  %v1280_v59 = vsel %vm94_vm5, 1.0, %v1112_v33  ;;  %v128_v60 = vsel %vm124_vm3, %v123_v56, %v120_v39  ;;  %v118_v61 = vmul.f32 %v1276_v57, %v113_v58  ;;  %v125_v0 = vsel %vm124_vm3, %v122_v30, %v123_v56 }
   0xf   :  { %353 = vmatpush.bf16.msra.mxu1 %v1051_v12  ;;  %v132_v63 = vmul.f32 %v1280_v59, %v128_v60 }
  0x10   :  { %372 = vmatpush.bf16.msra.mxu2 %v1059_v13  ;;  %v136_v1 = vpack.c.bf16 %v112_v62, %v118_v61 }
  0x11   :  { %v138_v3 = vpack.c.bf16 %v132_v63, %v125_v0  ;;  %v1078_v63 = vld [vmem:[%s1474_s4 + $0x78] sm:$0xff]  ;;  %v1077_v0 = vld [vmem:[%s1474_s4 + $0x70] sm:$0xff] }
  0x12   :  { %335 = vmatpush.bf16.msra.mxu0 %v1042_v15 }
  0x13   :  { %354 = vmatpush.bf16.msra.mxu1 %v1050_v16 }
  0x14   :  { %373 = vmatpush.bf16.msra.mxu2 %v1058_v17 }
  0x16   :  { %336 = vmatpush.bf16.msra.mxu0 %v1041_v24 }
  0x17   :  { %355 = vmatpush.bf16.msra.mxu1 %v1049_v25 }
  0x18   :  { %374 = vmatpush.bf16.msra.mxu2 %v1057_v28 }
  0x1a   :  { %337 = vmatpush.bf16.msra.mxu0 %v1040_v31 }
  0x1b   :  { %356 = vmatpush.bf16.msra.mxu1 %v1048_v32 }
  0x1c   :  { %375 = vmatpush.bf16.msra.mxu2 %v1056_v37 }
  0x1e   :  { %338 = vmatpush.bf16.msra.mxu0 %v1039_v42 }
  0x1f   :  { %357 = vmatpush.bf16.msra.mxu1 %v1047_v43 }
  0x20   :  { %376 = vmatpush.bf16.msra.mxu2 %v1055_v46 }
  0x21   :  { %339 = vmatmul.bf16.vlgmr.msra.gmra.mxu0 %v133_v50 }
  0x22   :  { %358 = vmatmul.bf16.vlgmr.msra.gmra.mxu1 %v134_v51  ;;  %713 = vmatpush.bf16.msrb.mxu0 %v1078_v63 }
  0x23   :  { %377 = vmatmul.bf16.vlgmr.msra.gmra.mxu2 %v135_v52 }
  0x24   :  { %1087 = vmatpush.bf16.msrb.mxu2 %v1078_v63 }
  0x26   :  { %714 = vmatpush.bf16.msrb.mxu0 %v1077_v0 }
  0x28   :  { %1088 = vmatpush.bf16.msrb.mxu2 %v1077_v0 }
  0x31   :  { %344 = vmatmul.bf16.gmra.mxu0 %v136_v1  ;;  %v1070_v1 = vld [vmem:[%s1474_s4 + $0x38] sm:$0xff] }
  0x32   :  { %363 = vmatmul.bf16.gmra.mxu1 %v137_v2  ;;  %v1086_v2 = vld [vmem:[%s1474_s4 + $0xb8] sm:$0xff]  ;;  %694 = vmatpush.bf16.msra.mxu3 %v1070_v1 }
  0x33   :  { %382 = vmatmul.bf16.gmra.mxu2 %v138_v3  ;;  %732 = vmatpush.bf16.msrb.mxu1 %v1086_v2  ;;  %v1076_v3 = vld [vmem:[%s1474_s4 + $0x68] sm:$0xff] }
  0x34   :  { %715 = vmatpush.bf16.msrb.mxu0 %v1076_v3  ;;  %1089 = vmatpush.bf16.msrb.mxu2 %v1076_v3 }
  0x9e   :  { %v340_v4 = vpop.f32.mrf.mxu0 }
  0x9f   :  { %v359_v5 = vpop.f32.mrf.mxu1 }
  0xa0   :  { %v360_v13 = vadd.f32 %v359_v5, %v340_v4  ;;  %v1069_v4 = vld [vmem:[%s1474_s4 + $0x30] sm:$0xff] }
  0xa1   :  { %v1085_v5 = vld [vmem:[%s1474_s4 + $0xb0] sm:$0xff]  ;;  %695 = vmatpush.bf16.msra.mxu3 %v1069_v4 }
  0xa2   :  { %733 = vmatpush.bf16.msrb.mxu1 %v1085_v5 }
  0xa6   :  { %v378_v6 = vpop.f32.mrf.mxu2  ;;  %v342_v7 = vpop.f32.mrf.mxu0 }
  0xa7   :  { %v361_v8 = vpop.f32.mrf.mxu1  ;;  %v1294_v18 = vadd.f32 %v378_v6, %v360_v13  ;;  %v1075_v6 = vld [vmem:[%s1474_s4 + $0x60] sm:$0xff] }
  0xa8   :  { %v362_v14 = vadd.f32 %v361_v8, %v342_v7  ;;  %v1068_v7 = vld [vmem:[%s1474_s4 + $0x28] sm:$0xff]  ;;  %716 = vmatpush.bf16.msrb.mxu0 %v1075_v6  ;;  %1090 = vmatpush.bf16.msrb.mxu2 %v1075_v6  ;;  %v1083_v13 = vld [vmem:[%s1474_s4 + $0xa0] sm:$0xff] }
  0xa9   :  { %v411_v23 = vmul.f32 %v1294_v18, %v1294_v18  ;;  %v1084_v8 = vld [vmem:[%s1474_s4 + $0xa8] sm:$0xff]  ;;  %696 = vmatpush.bf16.msra.mxu3 %v1068_v7 }
  0xaa   :  { %734 = vmatpush.bf16.msrb.mxu1 %v1084_v8 }
  0xae   :  { %v380_v9 = vpop.f32.mrf.mxu2  ;;  %v345_v11 = vpop.f32.mrf.mxu0  ;;  %735 = vmatpush.bf16.msrb.mxu1 %v1083_v13 }
  0xaf   :  { %v364_v12 = vpop.f32.mrf.mxu1  ;;  %v1292_v17 = vadd.f32 %v380_v9, %v362_v14 }
  0xb0   :  { %v365_v15 = vadd.f32 %v364_v12, %v345_v11  ;;  %v1074_v11 = vld [vmem:[%s1474_s4 + $0x58] sm:$0xff]  ;;  %v1067_v12 = vld [vmem:[%s1474_s4 + $0x20] sm:$0xff] }
  0xb1   :  { %v412_v22 = vmul.f32 %v1292_v17, %v1292_v17  ;;  %v390_v24 = vadd.f32 %v1292_v17, %v1294_v18  ;;  %717 = vmatpush.bf16.msrb.mxu0 %v1074_v11  ;;  %1091 = vmatpush.bf16.msrb.mxu2 %v1074_v11 }
  0xb2   :  { %697 = vmatpush.bf16.msra.mxu3 %v1067_v12 }
  0xb3   :  { %v415_v28 = vadd.f32 %v412_v22, %v411_v23  ;;  %v1072_v23 = vld [vmem:[%s1474_s4 + $0x48] sm:$0xff] }
  0xb6   :  { %v383_v16 = vpop.f32.mrf.mxu2  ;;  %v347_v20 = vpop.f32.mrf.mxu0 }
  0xb7   :  { %v1296_v19 = vadd.f32 %v383_v16, %v365_v15  ;;  %v366_v21 = vpop.f32.mrf.mxu1  ;;  %v1073_v15 = vld [vmem:[%s1474_s4 + $0x50] sm:$0xff]  ;;  %v1066_v16 = vld [vmem:[%s1474_s4 + $0x18] sm:$0xff] }
  0xb8   :  { %v367_v26 = vadd.f32 %v366_v21, %v347_v20  ;;  %v1082_v20 = vld [vmem:[%s1474_s4 + $0x98] sm:$0xff]  ;;  %718 = vmatpush.bf16.msrb.mxu0 %v1073_v15  ;;  %1092 = vmatpush.bf16.msrb.mxu2 %v1073_v15 }
  0xb9   :  { %v413_v25 = vmul.f32 %v1296_v19, %v1296_v19  ;;  %v391_v29 = vadd.f32 %v390_v24, %v1296_v19  ;;  %698 = vmatpush.bf16.msra.mxu3 %v1066_v16  ;;  %736 = vmatpush.bf16.msrb.mxu1 %v1082_v20 }
  0xbb   :  { %v416_v31 = vadd.f32 %v415_v28, %v413_v25  ;;  %v1065_v25 = vld [vmem:[%s1474_s4 + $0x10] sm:$0xff] }
  0xbc   :  { %719 = vmatpush.bf16.msrb.mxu0 %v1072_v23  ;;  %1093 = vmatpush.bf16.msrb.mxu2 %v1072_v23 }
  0xbd   :  { %699 = vmatpush.bf16.msra.mxu3 %v1065_v25 }
  0xbe   :  { %v385_v27 = vpop.f32.mrf.mxu2 }
  0xbf   :  { %v1307_v30 = vadd.f32 %v385_v27, %v367_v26  ;;  %v1081_v26 = vld [vmem:[%s1474_s4 + $0x90] sm:$0xff]  ;;  %v1071_v27 = vld [vmem:[%s1474_s4 + $0x40] sm:$0xff] }
  0xc0   :  { %737 = vmatpush.bf16.msrb.mxu1 %v1081_v26  ;;  %720 = vmatpush.bf16.msrb.mxu0 %v1071_v27 }
  0xc1   :  { %v392_v32 = vadd.f32 %v391_v29, %v1307_v30  ;;  %v414_v33 = vmul.f32 %v1307_v30, %v1307_v30  ;;  %1094 = vmatpush.bf16.msrb.mxu2 %v1071_v27 }
  0xc3   :  { %v393_v35 = vrot.slane %v392_v32, 4  ;;  %v417_v36 = vadd.f32 %v416_v31, %v414_v33  ;;  %v1064_v31 = vld [vmem:[%s1474_s4 + $0x8] sm:$0xff] }
  0xc4   :  { %700 = vmatpush.bf16.msra.mxu3 %v1064_v31 }
  0xc5   :  { %v418_v37 = vrot.slane %v417_v36, 4  ;;  %v394_v39 = vadd.f32 %v393_v35, %v392_v32  ;;  %v1080_v32 = vld [vmem:[%s1474_s4 + $0x88] sm:$0xff] }
  0xc6   :  { %738 = vmatpush.bf16.msrb.mxu1 %v1080_v32 }
  0xc7   :  { %v395_v40 = vrot.slane %v394_v39, 2  ;;  %v419_v41 = vadd.f32 %v418_v37, %v417_v36  ;;  %v1063_v36 = vld [vmem:[%s1474_s4] sm:$0xff] }
  0xc8   :  { %v1079_v37 = vld [vmem:[%s1474_s4 + $0x80] sm:$0xff]  ;;  %701 = vmatpush.bf16.msra.mxu3 %v1063_v36 }
  0xc9   :  { %v396_v42 = vadd.f32 %v395_v40, %v394_v39  ;;  %v420_v43 = vrot.slane %v419_v41, 2 }
  0xca   :  { %739 = vmatpush.bf16.msrb.mxu1 %v1079_v37 }
  0xcb   :  { %v397_v44 = vrot.slane %v396_v42, 1  ;;  %v421_v46 = vadd.f32 %v420_v43, %v419_v41 }
  0xcc   :  { %1095 = vmatpush.bf16.msrb.mxu3 %v1086_v2 }
  0xcd   :  { %v398_v45 = vadd.f32 %v397_v44, %v396_v42  ;;  %v422_v47 = vrot.slane %v421_v46, 1  ;;  %v388_v44 = vld [vmem:[%s1475_s2] sm:$0x1] }
  0xcf   :  { %399 = vrot.lane.b32.xlu0 %v398_v45, %s1113_s1  ;;  %v423_v48 = vadd.f32 %v422_v47, %v421_v46 }
  0xd0   :  { %1096 = vmatpush.bf16.msrb.mxu3 %v1085_v5 }
  0xd4   :  { %1097 = vmatpush.bf16.msrb.mxu3 %v1084_v8 }
  0xd7   :  { %424 = vrot.lane.b32.xlu0 %v423_v48, %s1113_s1 }
  0xd8   :  { %1098 = vmatpush.bf16.msrb.mxu3 %v1083_v13 }
  0xdc   :  { %1099 = vmatpush.bf16.msrb.mxu3 %v1082_v20 }
  0xe0   :  { %1100 = vmatpush.bf16.msrb.mxu3 %v1081_v26 }
  0xe4   :  { %1101 = vmatpush.bf16.msrb.mxu3 %v1080_v32 }
  0xe8   :  { %1102 = vmatpush.bf16.msrb.mxu3 %v1079_v37 }
 0x141   :  { %v400_v49 = vpop.permute.xlu0 %399 }
 0x142   :  { %v401_v50 = vadd.f32 %v400_v49, %v398_v45 }
 0x144   :  { %402 = vrot.lane.b32.xlu1 %v401_v50, %s1114_s10 }
 0x149   :  { %v425_v51 = vpop.permute.xlu0 %424 }
 0x14a   :  { %v426_v52 = vadd.f32 %v425_v51, %v423_v48  ;;  %v389_v48 = vld [vmem:[%s1476_s3] sm:$0x1] }
 0x14c   :  { %427 = vrot.lane.b32.xlu1 %v426_v52, %s1114_s10 }
 0x1b6   :  { %v403_v53 = vpop.permute.xlu1 %402 }
 0x1b7   :  { %v404_v54 = vadd.f32 %v403_v53, %v401_v50 }
 0x1b9   :  { %405 = vrot.lane.b32.xlu2 %v404_v54, %s1115_s11 }
 0x1be   :  { %v428_v55 = vpop.permute.xlu1 %427 }
 0x1bf   :  { %v429_v56 = vadd.f32 %v428_v55, %v426_v52 }
 0x1c1   :  { %430 = vrot.lane.b32.xlu2 %v429_v56, %s1115_s11 }
 0x213   :  { %v406_v58 = vpop.permute.xlu2 %405 }
 0x214   :  { %v407_v60 = vadd.f32 %v406_v58, %v404_v54 }
 0x216   :  { %408 = vrot.lane.b32.xlu0 %v407_v60, %s1116_s12 }
 0x21b   :  { %v431_v61 = vpop.permute.xlu2 %430 }
 0x21c   :  { %v432_v62 = vadd.f32 %v431_v61, %v429_v56 }
 0x21e   :  { %433 = vrot.lane.b32.xlu1 %v432_v62, %s1116_s12 }
 0x288   :  { %v409_v9 = vpop.permute.xlu0 %408 }
 0x289   :  { %v410_v14 = vadd.f32 %v409_v9, %v407_v60 }
 0x28b   :  { %v436_v21 = vmul.f32 0.001953125, %v410_v14 }
 0x28d   :  { %v438_v28 = vmul.f32 %v436_v21, %v436_v21 }
 0x290   :  { %v434_v22 = vpop.permute.xlu1 %433 }
 0x291   :  { %v435_v24 = vadd.f32 %v434_v22, %v432_v62 }
 0x293   :  { %v437_v29 = vmul.f32 0.001953125, %v435_v24 }
 0x295   :  { %v439_v33 = vsub.f32 %v437_v29, %v438_v28 }
 0x297   :  { %v440_v35 = vadd.f32 1e-05, %v439_v33 }
 0x299   :  { %1108 = vrsqrt.f32 %v440_v35  ;;  %vm447_vm7 = vweird.f32 %v440_v35 }
 0x29f   :  { %v1109_v39 = vpop.eup %1108 }
 0x2a0   :  { %v442_v40 = vmul.f32 %v1109_v39, %v440_v35  ;;  %vm448_vm6 = vweird.f32 %v1109_v39 }
 0x2a1   :  { %vm449_vm8 = vmor %vm447_vm7, %vm448_vm6 }
 0x2a2   :  { %v443_v41 = vmul.f32 %v1109_v39, %v442_v40 }
 0x2a4   :  { %v444_v42 = vmul.f32 0.5, %v443_v41 }
 0x2a6   :  { %v445_v43 = vsub.f32 1.5, %v444_v42 }
 0x2a8   :  { %v446_v45 = vmul.f32 %v1109_v39, %v445_v43 }
 0x2aa   :  { %v450_v46 = vsel %vm449_vm8, %v1109_v39, %v446_v45 }
 0x2ab   :  { %v451_v47 = vmul.f32 %v450_v46, %v388_v44 }
 0x2ad   :  { %v452_v49 = vmul.f32 %v451_v47, %v436_v21  ;;  %v455_v50 = vperm.slane %v451_v47, 0 }
 0x2af   :  { %v453_v51 = vsub.f32 %v389_v48, %v452_v49  ;;  %v457_v52 = vmul.f32 %v455_v50, %v1294_v18  ;;  %v458_v54 = vmul.f32 %v455_v50, %v1292_v17  ;;  %v459_v55 = vmul.f32 %v455_v50, %v1296_v19 }
 0x2b0   :  { %v460_v56 = vmul.f32 %v455_v50, %v1307_v30 }
 0x2b1   :  { %v462_v53 = vperm.slane %v453_v51, 0 }
 0x2b3   :  { %v464_v58 = vadd.f32 %v462_v53, %v457_v52  ;;  %v465_v60 = vadd.f32 %v462_v53, %v458_v54  ;;  %v466_v61 = vadd.f32 %v462_v53, %v459_v55  ;;  %v467_v62 = vadd.f32 %v462_v53, %v460_v56 }
 0x2b5   :  { %v468_v63 = vmax.f32 %v464_v58, 0.0  ;;  %v469_v0 = vmax.f32 %v465_v60, 0.0  ;;  %v470_v1 = vmax.f32 %v466_v61, 0.0  ;;  %v471_v2 = vmax.f32 %v467_v62, 0.0 }
 0x2b7   :  { %v497_v3 = vpack.c.bf16 %v469_v0, %v468_v63  ;;  %v500_v4 = vpack.c.bf16 %v471_v2, %v470_v1  ;;  %v472_v18 = vrot.slane %v468_v63, 7  ;;  %v473_v5 = vrot.slane %v469_v0, 7 }
 0x2b8   :  { %v475_v6 = vrot.slane %v471_v2, 7  ;;  %v484_v7 = vrot.slane %v468_v63, 1  ;;  %v485_v17 = vrot.slane %v469_v0, 1  ;;  %v486_v8 = vrot.slane %v470_v1, 1 }
 0x2b9   :  { %721 = vmatmul.bf16.vlgmr.msrb.gmra.mxu0 %v497_v3  ;;  %726 = vmatmul.bf16.vlgmr.msrb.gmra.mxu2 %v500_v4  ;;  %v478_v12 = vsel %vm111_vm1, %v472_v18, %v473_v5  ;;  %v474_v16 = vrot.slane %v470_v1, 7  ;;  %v487_v22 = vrot.slane %v471_v2, 1 }
 0x2ba   :  { %v479_v19 = vsel %vm111_vm1, %v475_v6, %v472_v18  ;;  %v489_v30 = vsel %vm124_vm3, %v485_v17, %v486_v8  ;;  %v490_v13 = vsel %vm124_vm3, %v484_v7, %v485_v17 }
 0x2bb   :  { %v480_v9 = vmul.f32 %v1244_v34, %v479_v19  ;;  %v493_v11 = vmul.f32 %v1251_v38, %v489_v30  ;;  %v477_v20 = vsel %vm111_vm1, %v473_v5, %v474_v16  ;;  %v476_v34 = vsel %vm111_vm1, %v474_v16, %v475_v6 }
 0x2bc   :  { %v482_v21 = vmul.f32 %v1276_v57, %v477_v20  ;;  %v491_v23 = vsel %vm124_vm3, %v487_v22, %v484_v7  ;;  %v488_v25 = vsel %vm124_vm3, %v486_v8, %v487_v22 }
 0x2bd   :  { %v496_v14 = vpack.c.bf16 %v478_v12, %v480_v9  ;;  %v498_v15 = vpack.c.bf16 %v493_v11, %v490_v13  ;;  %v495_v24 = vmul.f32 %v1280_v59, %v491_v23 }
 0x2be   :  { %v499_v38 = vpack.c.bf16 %v476_v34, %v482_v21 }
 0x2bf   :  { %702 = vmatmul.bf16.vlgmr.msra.gmra.mxu3 %v496_v14  ;;  %740 = vmatmul.bf16.vlgmr.msrb.gmra.mxu1 %v498_v15  ;;  %v501_v26 = vpack.c.bf16 %v495_v24, %v488_v25 }
 0x2cf   :  { %707 = vmatmul.bf16.gmra.mxu3 %v499_v38 }
 0x2df   :  { %745 = vmatmul.bf16.vlgmr.msrb.gmra.mxu3 %v501_v26 }
 0x336   :  { %v722_v57 = vpop.f32.mrf.mxu0 }
 0x33c   :  { %v741_v31 = vpop.f32.mrf.mxu1  ;;  %v727_v33 = vpop.f32.mrf.mxu2 }
 0x33e   :  { %v724_v35 = vpop.f32.mrf.mxu0 }
 0x342   :  { %v703_v27 = vpop.f32.mrf.mxu3 }
 0x343   :  { %v723_v37 = vadd.f32 %v722_v57, %v703_v27 }
 0x344   :  { %v743_v39 = vpop.f32.mrf.mxu1  ;;  %v729_v44 = vpop.f32.mrf.mxu2 }
 0x345   :  { %v1424_v42 = vadd.f32 %v741_v31, %v723_v37  ;;  %v751_v31 = vld [vmem:[%s1477_s5] sm:$0x1] }
 0x347   :  { %v774_v45 = vmul.f32 %v1424_v42, %v1424_v42 }
 0x34a   :  { %v705_v28 = vpop.f32.mrf.mxu3 }
 0x34b   :  { %v725_v36 = vadd.f32 %v724_v35, %v705_v28 }
 0x34d   :  { %v1422_v41 = vadd.f32 %v743_v39, %v725_v36  ;;  %v752_v36 = vld [vmem:[%s1478_s6] sm:$0x1] }
 0x34f   :  { %v775_v43 = vmul.f32 %v1422_v41, %v1422_v41  ;;  %v753_v47 = vadd.f32 %v1422_v41, %v1424_v42 }
 0x351   :  { %v778_v51 = vadd.f32 %v775_v43, %v774_v45 }
 0x352   :  { %v708_v29 = vpop.f32.mrf.mxu3 }
 0x353   :  { %v728_v59 = vadd.f32 %v727_v33, %v708_v29 }
 0x35a   :  { %v710_v32 = vpop.f32.mrf.mxu3 }
 0x35b   :  { %v730_v46 = vadd.f32 %v729_v44, %v710_v32 }
 0x362   :  { %v746_v40 = vpop.f32.mrf.mxu3 }
 0x363   :  { %v1426_v10 = vadd.f32 %v746_v40, %v728_v59 }
 0x365   :  { %v776_v48 = vmul.f32 %v1426_v10, %v1426_v10  ;;  %v754_v50 = vadd.f32 %v753_v47, %v1426_v10 }
 0x367   :  { %v779_v53 = vadd.f32 %v778_v51, %v776_v48 }
 0x36a   :  { %v748_v49 = vpop.f32.mrf.mxu3 }
 0x36b   :  { %v1437_v52 = vadd.f32 %v748_v49, %v730_v46 }
 0x36d   :  { %v755_v54 = vadd.f32 %v754_v50, %v1437_v52  ;;  %v777_v55 = vmul.f32 %v1437_v52, %v1437_v52 }
 0x36f   :  { %v756_v56 = vrot.slane %v755_v54, 4  ;;  %v780_v58 = vadd.f32 %v779_v53, %v777_v55 }
 0x371   :  { %v757_v60 = vadd.f32 %v756_v56, %v755_v54  ;;  %v781_v61 = vrot.slane %v780_v58, 4 }
 0x373   :  { %v758_v62 = vrot.slane %v757_v60, 2  ;;  %v782_v63 = vadd.f32 %v781_v61, %v780_v58 }
 0x375   :  { %v759_v0 = vadd.f32 %v758_v62, %v757_v60  ;;  %v783_v1 = vrot.slane %v782_v63, 2 }
 0x377   :  { %v760_v2 = vrot.slane %v759_v0, 1  ;;  %v784_v3 = vadd.f32 %v783_v1, %v782_v63 }
 0x379   :  { %v761_v4 = vadd.f32 %v760_v2, %v759_v0  ;;  %v785_v18 = vrot.slane %v784_v3, 1 }
 0x37b   :  { %762 = vrot.lane.b32.xlu2 %v761_v4, %s1113_s1  ;;  %v786_v5 = vadd.f32 %v785_v18, %v784_v3 }
 0x37d   :  { %787 = vrot.lane.b32.xlu0 %v786_v5, %s1113_s1 }
 0x3d5   :  { %v763_v6 = vpop.permute.xlu2 %762 }
 0x3d6   :  { %v764_v7 = vadd.f32 %v763_v6, %v761_v4 }
 0x3d8   :  { %765 = vrot.lane.b32.xlu1 %v764_v7, %s1114_s10 }
 0x3ef   :  { %v788_v17 = vpop.permute.xlu0 %787 }
 0x3f0   :  { %v789_v8 = vadd.f32 %v788_v17, %v786_v5 }
 0x3f2   :  { %790 = vrot.lane.b32.xlu2 %v789_v8, %s1114_s10 }
 0x44a   :  { %v766_v19 = vpop.permute.xlu1 %765 }
 0x44b   :  { %v767_v30 = vadd.f32 %v766_v19, %v764_v7 }
 0x44c   :  { %v791_v9 = vpop.permute.xlu2 %790 }
 0x44d   :  { %v792_v11 = vadd.f32 %v791_v9, %v789_v8  ;;  %768 = vrot.lane.b32.xlu0 %v767_v30, %s1115_s11 }
 0x44f   :  { %793 = vrot.lane.b32.xlu1 %v792_v11, %s1115_s11 }
 0x4bf   :  { %v769_v12 = vpop.permute.xlu0 %768 }
 0x4c0   :  { %v770_v13 = vadd.f32 %v769_v12, %v767_v30 }
 0x4c1   :  { %v794_v14 = vpop.permute.xlu1 %793 }
 0x4c2   :  { %v795_v15 = vadd.f32 %v794_v14, %v792_v11  ;;  %771 = vrot.lane.b32.xlu2 %v770_v13, %s1116_s12 }
 0x4c4   :  { %796 = vrot.lane.b32.xlu0 %v795_v15, %s1116_s12 }
 0x51c   :  { %v772_v16 = vpop.permute.xlu2 %771 }
 0x51d   :  { %v773_v20 = vadd.f32 %v772_v16, %v770_v13 }
 0x51f   :  { %v799_v21 = vmul.f32 0.001953125, %v773_v20 }
 0x521   :  { %v801_v22 = vmul.f32 %v799_v21, %v799_v21 }
 0x536   :  { %v797_v34 = vpop.permute.xlu0 %796 }
 0x537   :  { %v798_v38 = vadd.f32 %v797_v34, %v795_v15 }
 0x539   :  { %v800_v23 = vmul.f32 0.001953125, %v798_v38 }
 0x53b   :  { %v802_v24 = vsub.f32 %v800_v23, %v801_v22 }
 0x53d   :  { %v803_v25 = vadd.f32 1e-05, %v802_v24 }
 0x53f   :  { %1110 = vrsqrt.f32 %v803_v25  ;;  %vm810_vm10 = vweird.f32 %v803_v25 }
 0x545   :  { %v1111_v26 = vpop.eup %1110 }
 0x546   :  { %v805_v27 = vmul.f32 %v1111_v26, %v803_v25  ;;  %vm811_vm9 = vweird.f32 %v1111_v26 }
 0x547   :  { %vm812_vm11 = vmor %vm810_vm10, %vm811_vm9 }
 0x548   :  { %v806_v28 = vmul.f32 %v1111_v26, %v805_v27 }
 0x54a   :  { %v807_v29 = vmul.f32 0.5, %v806_v28 }
 0x54c   :  { %v808_v57 = vsub.f32 1.5, %v807_v29 }
 0x54e   :  { %v809_v32 = vmul.f32 %v1111_v26, %v808_v57 }
 0x550   :  { %v813_v33 = vsel %vm812_vm11, %v1111_v26, %v809_v32 }
 0x551   :  { %v814_v35 = vmul.f32 %v813_v33, %v751_v31 }
 0x553   :  { %v815_v37 = vmul.f32 %v814_v35, %v799_v21  ;;  %v818_v39 = vperm.slane %v814_v35, 0 }
 0x555   :  { %v816_v40 = vsub.f32 %v752_v36, %v815_v37  ;;  %v820_v59 = vmul.f32 %v818_v39, %v1424_v42  ;;  %v821_v43 = vmul.f32 %v818_v39, %v1422_v41  ;;  %v822_v44 = vmul.f32 %v818_v39, %v1426_v10 }
 0x556   :  { %v823_v45 = vmul.f32 %v818_v39, %v1437_v52 }
 0x557   :  { %v825_v46 = vperm.slane %v816_v40, 0 }
 0x559   :  { %v827_v47 = vadd.f32 %v825_v46, %v820_v59  ;;  %v828_v48 = vadd.f32 %v825_v46, %v821_v43  ;;  %v829_v49 = vadd.f32 %v825_v46, %v822_v44  ;;  %v830_v50 = vadd.f32 %v825_v46, %v823_v45 }
 0x55b   :  { %v831_v51 = vmax.f32 %v827_v47, 0.0  ;;  %v832_v53 = vmax.f32 %v828_v48, 0.0  ;;  %v833_v54 = vmax.f32 %v829_v49, 0.0  ;;  %v834_v55 = vmax.f32 %v830_v50, 0.0 }
 0x55d   :  { %835 = vst [vmem:[%s1479_s7] sm:$0xff] %v831_v51 }
 0x55e   :  { %836 = vst [vmem:[%s1479_s7 + $0x8] sm:$0xff] %v832_v53 }
 0x55f   :  { %837 = vst [vmem:[%s1479_s7 + $0x10] sm:$0xff] %v833_v54 }
 0x560   :  { %838 = vst [vmem:[%s1479_s7 + $0x18] sm:$0xff] %v834_v55 }

</bundles_post_ra>
